<compile_context>
chip_gen: v6e
topology: v6e:2x2x1
jax: 0.10.0
libtpu: 0.0.40
codegen_flags: <defaults>
</compile_context>

<pallas_src>
from functools import partial

import numpy as np
import jax
import jax.numpy as jnp
from jax.experimental import pallas as pl
from jax.experimental.pallas import tpu as pltpu


# ----------------------- trace-time helpers (pure index math) -----------------------

def _shuffle_perm(c, group):
    # channel_shuffle:  shuffled[:, j] = x[:, perm[j]]
    return np.arange(c).reshape(c // group, group).T.reshape(-1)


def _rearrange_perm(c, group):
    # channel_rearrange: rearranged[:, j] = y[:, perm[j]]
    return np.arange(c).reshape(group, c // group).T.reshape(-1)


def _folded_weight_bias(w_conv, b_conv, group):
    """Dense (C_in, C_out) block-diagonal weight of the grouped 1x1 conv with the
    channel_shuffle folded into its rows and the channel_rearrange folded into its
    columns (and bias).  Built once with numpy, outside the kernel."""
    w = np.asarray(w_conv, dtype=np.float32)[:, :, 0, 0]          # (C_out, icg)
    b = np.asarray(b_conv, dtype=np.float32)                       # (C_out,)
    C_out, icg = w.shape
    ocg = C_out // group
    C_in = icg * group

    Wd = np.zeros((C_in, C_out), np.float32)
    for g in range(group):
        Wd[g * icg:(g + 1) * icg, g * ocg:(g + 1) * ocg] = w[g * ocg:(g + 1) * ocg].T

    # fold channel_shuffle into rows:  pooled_shuffled @ Wd == pooled_original @ Wd_rows
    sperm = _shuffle_perm(C_in, group)
    Wd_rows = np.zeros_like(Wd)
    Wd_rows[sperm, :] = Wd
    # fold channel_rearrange into columns (sigmoid is elementwise, so it commutes)
    rperm = _rearrange_perm(C_out, group)
    Wd_fold = Wd_rows[:, rperm]
    b_fold = b[rperm]
    return jnp.asarray(Wd_fold), jnp.asarray(b_fold.reshape(1, C_out))


def _choose_hw_tile(C, HW, itemsize, target_block_bytes=4 << 20):
    """Pick (T_HW, HW_padded).  T_HW is a multiple of 128 (lane-aligned DMA) or the full
    extent; the (1, C, T_HW) block targets ~4 MiB.  Only pad HW when unavoidable."""
    row_bytes = max(C * itemsize, 1)
    cap = max(128, (target_block_bytes // row_bytes) // 128 * 128)
    if HW % 128 == 0:
        q = HW // 128
        best = 128
        for d in range(1, q + 1):
            if q % d == 0 and d * 128 <= cap:
                best = d * 128
        return best, HW
    # HW not lane-aligned: full-extent block if it is small enough, else zero-pad.
    if HW * row_bytes <= target_block_bytes:
        return HW, HW
    t = min(cap, ((HW + 127) // 128) * 128)
    hw_pad = ((HW + t - 1) // t) * t
    return t, hw_pad


# ----------------------------------- Pallas kernel -----------------------------------

def _shuffle_attn_kernel(x_ref, w_ref, b_ref, o_ref, acc_ref, *, inv_hw):
    # x_ref  : (1, C, T_HW)  spatial tile of the ORIGINAL (un-shuffled) input
    # w_ref  : (C, C_out)    block-diag 1x1-conv weight with both permutations folded in
    # b_ref  : (1, C_out)    permuted conv bias
    # o_ref  : (1, 1, C_out) final sigmoid gate (already channel-rearranged)
    # acc_ref: (1, C) f32    running spatial sum (VMEM scratch, lives across k)
    k = pl.program_id(1)

    @pl.when(k == 0)
    def _():
        acc_ref[...] = jnp.zeros_like(acc_ref)

    # partial spatial pool for this tile
    acc_ref[...] += jnp.sum(x_ref[...].astype(jnp.float32), axis=-1)

    @pl.when(k == pl.num_programs(1) - 1)
    def _():
        pooled = acc_ref[...] * inv_hw                                  # mean = sum / HW
        y = jnp.dot(pooled, w_ref[...],
                    preferred_element_type=jnp.float32) + b_ref[...]    # grouped 1x1 conv
        o_ref[:, 0, :] = jax.nn.sigmoid(y).astype(o_ref.dtype)


def shuffle_attn_forward(x, w_conv, b_conv, group):
    """x: (B, C, H, W) NCHW.  w_conv: (C_out, C//group, 1, 1).  b_conv: (C_out,)."""
    B, C, H, W = x.shape
    C_out = w_conv.shape[0]
    assert C % group == 0 and C_out % group == 0
    HW = H * W

    Wd, bias2d = _folded_weight_bias(w_conv, b_conv, group)

    T_HW, HW_pad = _choose_hw_tile(C, HW, x.dtype.itemsize)
    x_flat = x.reshape(B, C, HW)                       # copy-free view of contiguous NCHW
    if HW_pad != HW:
        # zeros do not perturb the sum; the mean divides by the true HW below
        x_flat = jnp.pad(x_flat, ((0, 0), (0, 0), (0, HW_pad - HW)))

    grid = (B, HW_pad // T_HW)

    block_bytes = C * T_HW * x_flat.dtype.itemsize
    needed = 3 * block_bytes + (C * C_out + C_out) * 4 * 2 + (4 << 20)
    vmem_limit = int(min(max(needed, 32 << 20), 64 << 20))

    kernel = partial(_shuffle_attn_kernel, inv_hw=np.float32(1.0 / HW))

    out = pl.pallas_call(
        kernel,
        out_shape=jax.ShapeDtypeStruct((B, 1, C_out), x.dtype),
        grid_spec=pltpu.PrefetchScalarGridSpec(
            num_scalar_prefetch=0,
            grid=grid,
            in_specs=[
                pl.BlockSpec((1, C, T_HW), lambda b, k: (b, 0, k)),
                pl.BlockSpec((C, C_out), lambda b, k: (0, 0)),
                pl.BlockSpec((1, C_out), lambda b, k: (0, 0)),
            ],
            out_specs=pl.BlockSpec((1, 1, C_out), lambda b, k: (b, 0, 0)),
            scratch_shapes=[pltpu.VMEM((1, C), jnp.float32)],
        ),
        compiler_params=pltpu.CompilerParams(
            dimension_semantics=("parallel", "arbitrary"),
            vmem_limit_bytes=vmem_limit,
        ),
    )(x_flat, Wd, bias2d)

    return out.reshape(B, C_out, 1, 1)


# --------------------------------- pure-JAX reference ---------------------------------

def channel_shuffle(x, group):
    b, c, h, w = x.shape
    gc = c // group
    return x.reshape(b, gc, group, h, w).transpose(0, 2, 1, 3, 4).reshape(b, c, h, w)


def channel_rearrange(x, group):
    b, c, h, w = x.shape
    gc = c // group
    return x.reshape(b, group, gc, h, w).transpose(0, 2, 1, 3, 4).reshape(b, c, h, w)


def shuffle_attn_ref(x, w_conv, b_conv, group):
    B, C, H, W = x.shape
    C_out = w_conv.shape[0]
    icg, ocg = C // group, C_out // group
    xs = channel_shuffle(x, group).astype(jnp.float32)
    pooled = jnp.mean(xs, axis=(2, 3))                     # (B, C)  == AdaptiveAvgPool2d(1)
    outs = []
    for g in range(group):
        pg = pooled[:, g * icg:(g + 1) * icg]
        wg = w_conv[g * ocg:(g + 1) * ocg, :, 0, 0].astype(jnp.float32)
        outs.append(pg @ wg.T + b_conv[g * ocg:(g + 1) * ocg])
    y = jax.nn.sigmoid(jnp.concatenate(outs, axis=1)).reshape(B, C_out, 1, 1)
    return channel_rearrange(y, group)


# ---------------------------------------- main ----------------------------------------

if __name__ == "__main__":
    B, C, H, W = 2, 8, 16, 16
    group = 4
    in_features = out_features = C

    key = jax.random.PRNGKey(0)
    kx, kw, kb = jax.random.split(key, 3)
    x = jax.random.normal(kx, (B, C, H, W), dtype=jnp.float32)
    w_conv = 0.1 * jax.random.normal(kw, (out_features, in_features // group, 1, 1),
                                     dtype=jnp.float32)
    b_conv = 0.05 * jax.random.normal(kb, (out_features,), dtype=jnp.float32)

    out = shuffle_attn_forward(x, w_conv, b_conv, group)
    out = jax.block_until_ready(out)

    ref = shuffle_attn_ref(x, w_conv, b_conv, group)
    assert out.shape == (B, out_features, 1, 1), out.shape
    np.testing.assert_allclose(np.asarray(out), np.asarray(ref), rtol=1e-5, atol=1e-5)

    print("KERNEL_OK")
</pallas_src>

<mosaic_0001>
module attributes {stable_mosaic.version = 11 : i64} {
  func.func @_shuffle_attn_kernel(%arg0: i32, %arg1: i32, %arg2: memref<1x8x256xf32, #tpu.memory_space<vmem>>, %arg3: memref<8x8xf32, #tpu.memory_space<vmem>>, %arg4: memref<1x8xf32, #tpu.memory_space<vmem>>, %arg5: memref<1x1x8xf32, #tpu.memory_space<vmem>>, %arg6: memref<1x8xf32, #tpu.memory_space<vmem>>) attributes {dimension_semantics = [#tpu.dimension_semantics<parallel>, #tpu.dimension_semantics<arbitrary>], iteration_bounds = array<i64: 2, 1>, scalar_prefetch = 0 : i64, scratch_operands = 1 : i64, tpu.core_type = #tpu.core_type<tc>, window_params = [{transform_indices = @transform_0, window_bounds = array<i64: 1, 8, 256>}, {pipeline_mode = #tpu.pipeline_mode<synchronous>, transform_indices = @transform_1, window_bounds = array<i64: 8, 8>}, {pipeline_mode = #tpu.pipeline_mode<synchronous>, transform_indices = @transform_2, window_bounds = array<i64: 1, 8>}, {transform_indices = @transform_3, window_bounds = array<i64: 1, 1, 8>}]} {
    %c0_i32 = arith.constant 0 : i32
    %0 = arith.cmpi eq, %arg1, %c0_i32 : i32
    %1 = arith.extui %0 : i1 to i32
    %c0_i32_0 = arith.constant 0 : i32
    %2 = arith.cmpi ne, %1, %c0_i32_0 : i32
    scf.if %2 {
      %cst_9 = arith.constant 0.000000e+00 : f32
      %11 = vector.broadcast %cst_9 : f32 to vector<1x8xf32>
      %c0_10 = arith.constant 0 : index
      %c0_11 = arith.constant 0 : index
      %12 = vector.load %arg6[%c0_10, %c0_11] : memref<1x8xf32, #tpu.memory_space<vmem>>, vector<1x8xf32>
      tpu.vector_store %arg6[%c0_10, %c0_11], %11 {strides = array<i32>} : memref<1x8xf32, #tpu.memory_space<vmem>>, vector<1x8xf32>,
    } else {
    }
    %c0 = arith.constant 0 : index
    %c0_1 = arith.constant 0 : index
    %3 = vector.load %arg6[%c0, %c0_1] : memref<1x8xf32, #tpu.memory_space<vmem>>, vector<1x8xf32>
    %c0_2 = arith.constant 0 : index
    %c0_3 = arith.constant 0 : index
    %c0_4 = arith.constant 0 : index
    %4 = vector.load %arg2[%c0_2, %c0_3, %c0_4] : memref<1x8x256xf32, #tpu.memory_space<vmem>>, vector<1x8x256xf32>
    %cst = arith.constant dense<0.000000e+00> : vector<1x8xf32>
    %5 = vector.multi_reduction <add>, %4, %cst [2] : vector<1x8x256xf32> to vector<1x8xf32>
    %6 = arith.addf %3, %5 : vector<1x8xf32>
    %c0_5 = arith.constant 0 : index
    %c0_6 = arith.constant 0 : index
    %7 = vector.load %arg6[%c0_5, %c0_6] : memref<1x8xf32, #tpu.memory_space<vmem>>, vector<1x8xf32>
    tpu.vector_store %arg6[%c0_5, %c0_6], %6 {strides = array<i32>} : memref<1x8xf32, #tpu.memory_space<vmem>>, vector<1x8xf32>,
    %c0_i32_7 = arith.constant 0 : i32
    %8 = arith.cmpi eq, %arg1, %c0_i32_7 : i32
    %9 = arith.extui %8 : i1 to i32
    %c0_i32_8 = arith.constant 0 : i32
    %10 = arith.cmpi ne, %9, %c0_i32_8 : i32
    scf.if %10 {
      %c0_9 = arith.constant 0 : index
      %c0_10 = arith.constant 0 : index
      %11 = vector.load %arg6[%c0_9, %c0_10] : memref<1x8xf32, #tpu.memory_space<vmem>>, vector<1x8xf32>
      %cst_11 = arith.constant 3.906250e-03 : f32
      %12 = vector.broadcast %cst_11 : f32 to vector<1x8xf32>
      %13 = arith.mulf %11, %12 : vector<1x8xf32>
      %c0_12 = arith.constant 0 : index
      %c0_13 = arith.constant 0 : index
      %14 = vector.load %arg3[%c0_12, %c0_13] : memref<8x8xf32, #tpu.memory_space<vmem>>, vector<8x8xf32>
      %cst_14 = arith.constant dense<0.000000e+00> : vector<1x8xf32>
      %15 = tpu.matmul %13, %14, %cst_14 {dimension_numbers = #tpu.dot_dimension_numbers<[1], [0], [0], [1], [0, 0, 1, 1], [], []>} : vector<1x8xf32>, vector<8x8xf32>, vector<1x8xf32> -> vector<1x8xf32>
      %c0_15 = arith.constant 0 : index
      %c0_16 = arith.constant 0 : index
      %16 = vector.load %arg4[%c0_15, %c0_16] : memref<1x8xf32, #tpu.memory_space<vmem>>, vector<1x8xf32>
      %17 = arith.addf %15, %16 : vector<1x8xf32>
      %18 = arith.negf %17 : vector<1x8xf32>
      %19 = math.exp %18 : vector<1x8xf32>
      %cst_17 = arith.constant 1.000000e+00 : f32
      %20 = vector.broadcast %cst_17 : f32 to vector<1x8xf32>
      %21 = arith.addf %20, %19 : vector<1x8xf32>
      %22 = arith.divf %20, %21 : vector<1x8xf32>
      %c0_18 = arith.constant 0 : index
      %c0_19 = arith.constant 0 : index
      %c0_20 = arith.constant 0 : index
      %23 = vector.load %arg5[%c0_18, %c0_19, %c0_20] : memref<1x1x8xf32, #tpu.memory_space<vmem>>, vector<1x1x8xf32>
      %24 = vector.shape_cast %23 : vector<1x1x8xf32> to vector<1x8xf32>
      %25 = vector.shape_cast %22 : vector<1x8xf32> to vector<1x1x8xf32>
      tpu.vector_store %arg5[%c0_18, %c0_19, %c0_20], %25 {strides = array<i32>} : memref<1x1x8xf32, #tpu.memory_space<vmem>>, vector<1x1x8xf32>,
    } else {
    }
    return
  }
  func.func @transform_0(%arg0: i32, %arg1: i32) -> (i32, i32, i32) {
    %c0_i32 = arith.constant 0 : i32
    %c0_i32_0 = arith.constant 0 : i32
    return %arg0, %c0_i32, %arg1 : i32, i32, i32
  }
  func.func @transform_1(%arg0: i32, %arg1: i32) -> (i32, i32) {
    %c0_i32 = arith.constant 0 : i32
    %c0_i32_0 = arith.constant 0 : i32
    %c0_i32_1 = arith.constant 0 : i32
    return %c0_i32, %c0_i32_0 : i32, i32
  }
  func.func @transform_2(%arg0: i32, %arg1: i32) -> (i32, i32) {
    %c0_i32 = arith.constant 0 : i32
    %c0_i32_0 = arith.constant 0 : i32
    %c0_i32_1 = arith.constant 0 : i32
    return %c0_i32, %c0_i32_0 : i32, i32
  }
  func.func @transform_3(%arg0: i32, %arg1: i32) -> (i32, i32, i32) {
    %c0_i32 = arith.constant 0 : i32
    %c0_i32_0 = arith.constant 0 : i32
    %c0_i32_1 = arith.constant 0 : i32
    return %arg0, %c0_i32, %c0_i32_0 : i32, i32, i32
  }
}

</mosaic_0001>

<bundles_post_ra>
// kernel: tpu_custom_call.1
= control target key start
LH: loop header
LB: loop body
LE: loop exit
PB: predicated region body
PF: predicated region fallthrough
CT: control target
= control target key end

     0   :  { %8 = vsyncpa [#allocation4], 0  ;;  %s972_s0 = inlined_call_operand.hbm [shape: f32[2,8,256], index: 0, kind: input, shape index: {}]   ;;  %s973_s1 = inlined_call_operand.hbm [shape: f32[8,8], index: 1, kind: input, shape index: {}]   ;;  %s974_s2 = inlined_call_operand.vmem [shape: f32[1,8], index: 2, kind: input, shape index: {}]   ;;  %s975_s3 = inlined_call_operand.hbm [shape: f32[2,1,8], index: 3, kind: output, shape index: {}]  }
   0x1   :  { %10 = vsyncpa [#allocation4 + $0x1], 0 }
   0x2   :  { %11 = vsyncpa [#allocation7], 0 }
   0x3   :  { %12 = vsyncpa [#allocation5], 0 }
   0x4   :  { %14 = vsyncpa [#allocation5 + $0x1], 0  ;;  %s798_s12 = smov 0   ;;  %s800_s13 = smov 0  }
   0x5   :  { %s802_s14 = smov 0   ;;  %s804_s15 = smov 0  }
   0x6   :  { %s806_s16 = smov 0   ;;  %s808_s17 = smov 0  }
   0x7 LB: > { %s525_s18 = sadd.s32 4294967295, %s769_s17   ;;  %s526_s19 = sadd.s32 4294967294, %s769_s17   ;;  %s769_s17 = sphi %s808_s17, %s20_s17   ;;  %s765_s16 = sphi %s806_s16, %s992_s16   ;;  %s761_s15 = sphi %s804_s15, %s991_s15   ;;  %s757_s14 = sphi %s802_s14, %s990_s14   ;;  %s753_s13 = sphi %s800_s13, %s989_s13   ;;  %s749_s12 = sphi %s798_s12, %s988_s12  }
   0x8   : > { %p54_p0 = scmp.ne.s32.totalorder %s753_s13, %s749_s12  ;;  %p832_p1 = scmp.eq.s32.totalorder %s525_s18, 0 }
   0x9   : > { %p836_p2 = scmp.eq.s32.totalorder %s525_s18, 1  ;;  %p126_p3 = scmp.eq.s32.totalorder %s526_s19, 1 }
   0xa   : > { %p842_p4 = por %p832_p1, %p54_p0  ;;  %p527_p5 = scmp.ge.s32.totalorder %s769_s17, 1 }
   0xb   : > { %p847_p6 = por %p126_p3, %p54_p0  ;;  %p133_p7 = scmp.lt.s32.totalorder %s769_s17, 3 }
   0xc   : > { %s979_s22 = scalar_select %p842_p4, 1, 0 }
   0xd   : > { %s980_s23 = scalar_select %p847_p6, 1, 0 }
   0xe   : > { %p852_p8 = pnand %p527_p5, %p133_p7  ;;  %s771_s25 = smov [#allocation6]  }
   0xf   : > { %s146_s26 = sshll.u32 %s771_s25, 4  ;;  %s32_s28 = sadd.s32 1, %s765_s16  ;;  %s147_s26 = int_to_ptr.vmem [resolvable:$true] %s146_s26 }
  0x10   : > { %p557_p10 = pneg %p852_p8  ;;  %s41_s29 = sadd.s32 1, %s757_s14 }
  0x11   : > { %p34_p12 = scmp.ge.s32.totalorder %s32_s28, 2  ;;  %s642_s30 = scalar_lea.vmem %s147_s26, 128 }
  0x12   : > { %p861_p11 = pnand %p557_p10, %p832_p1  ;;  %p643_p0 = scmp.ne.s32.totalorder %s147_s26, %s642_s30 }
  0x13   : > { %p650_p7 = scmp.lt.s32.totalorder %s147_s26, %s147_s26  ;;  %p651_p6 = scmp.lt.s32.totalorder %s642_s30, %s642_s30 }
  0x14   : > { %p633_p13 = pneg %p861_p11 }
  0x15   : > { %p652_p9 = por %p651_p6, %p650_p7 }
  0x16   : > { %p645_p3 = pnand %p643_p0, %p633_p13 }
  0x18   : > { %p646_p5 = pneg %p645_p3 }
  0x1a   : > { %p653_p4 = pnand %p652_p9, %p646_p5 }
  0x1c   : > { %656 = shalt.err (!%p653_p4)
}
  0x1d   : > { %560 = dma.hbm_to_vmem [thread:$0]  (!%p861_p11), %s973_s1, 128, %s147_s26, [#allocation7]  }
  0x1e   : > { %s994_s28 = smov (%p34_p12, %s32_s28), 0  ;;  %p48_p6 = scmp.ne.s32.totalorder %s757_s14, %s753_s13 }
  0x1f   : > { %p49_p4 = scmp.eq.s32.totalorder %s769_s17, 0  ;;  %s36_s6 = ssub.s32 %s765_s16, %s994_s28 }
  0x20   : > { %p570_p9 = scmp.lt.s32.totalorder %s769_s17, 2  ;;  %p39_p10 = scmp.eq.s32.totalorder %s36_s6, 0 }
  0x21   : > { %p50_p13 = por %p49_p4, %p48_p6  ;;  %p884_p0 = por %p836_p2, %p48_p6 }
  0x22   : > { %s160_s8 = sand.u32 1, %s757_s14   ;;  %s541_s11 = sshll.u32 %s765_s16, 8 }
  0x23   : > { %s890_s9 = scalar_select %p39_p10, %s757_s14, %s41_s29  }
  0x24   : > { %s530_s10 = sshll.u32 %s160_s8, 4  ;;  %s172_s25 = scalar_lea.hbm %s972_s0, %s541_s11 }
  0x25   : > { %s164_s26 = scalar_lea.vmem [#allocation3], %s530_s10  ;;  %p896_p11 = pnand %p570_p9, %p50_p13 }
  0x26   : > { %s174_s27 = sshll.u32 %s164_s26, 4  ;;  %s161_s21 = scalar_lea.sflag [#allocation4], %s160_s8  ;;  %s175_s27 = int_to_ptr.vmem [resolvable:$true] %s174_s27 }
  0x27   : > { %p659_p2 = pneg %p896_p11  ;;  %s670_s4 = scalar_lea.vmem %s175_s27, 256 }
  0x28   : > { %p671_p12 = scmp.ne.s32.totalorder %s175_s27, %s670_s4  ;;  %s772_s29 = smov [#allocation3]  }
  0x29   : > { %s675_s5 = sshll.u32 %s772_s29, 4  ;;  %s676_s5 = int_to_ptr.vmem [resolvable:$false] %s675_s5 }
  0x2a   : > { %p673_p3 = pnand %p671_p12, %p659_p2  ;;  %s677_s6 = scalar_lea.vmem %s676_s5, 512 }
  0x2b   : > { %p678_p7 = scmp.lt.s32.totalorder %s175_s27, %s676_s5  ;;  %p679_p6 = scmp.lt.s32.totalorder %s677_s6, %s670_s4 }
  0x2c   : > { %p674_p5 = pneg %p673_p3 }
  0x2d   : > { %p680_p4 = por %p679_p6, %p678_p7 }
  0x2f   : > { %p681_p10 = pnand %p680_p4, %p674_p5 }
  0x31   : > { %684 = shalt.err (!%p681_p10)
}
  0x32   : > { %564 = dma.hbm_to_vmem [thread:$0]  (!%p896_p11), %s172_s25, 256, %s175_s27, %s161_s21  }
  0x33   : > { %183 = sbr.rel (%p852_p8) target bundleno = 595 (0x253), region = 32  ;;  %s907_s8 = sand.u32 (!%p852_p8), 1, %s753_s13  }
  0x34   : > { %s534_s10 = sshll.u32 (!%p852_p8), %s907_s8, 4  ;;  %s186_s11 = scalar_lea.sflag (!%p852_p8), [#allocation4], %s907_s8 }
  0x35   : > { %s189_s18 = scalar_lea.vmem (!%p852_p8), [#allocation3], %s534_s10  ;;  %p985_p9 = scmp.ne.s32.totalorder (!%p852_p8), %s979_s22, 0 }
  0x38   : > { %736 = dma.done.wait (%p985_p9), %s186_s11, 256  }
  0x39   : > { %738 = vsyncadd (%p985_p9), %s186_s11, 4294967040 }
  0x3a   : > { %740 = dma.done.wait (%p832_p1), [#allocation7], 128  }
  0x3b   : > { %742 = vsyncadd (%p832_p1), [#allocation7], 4294967168  ;;  %v223_v0 = vld [vmem:[%s189_s18] sm:$0xff]  ;;  %v224_v1 = vld [vmem:[%s189_s18 + $0x8] sm:$0xff]  ;;  %v773_v3 = vmov 0   ;;  %v229_v4 = vlaneseq  ;;  %vm220_vm0 = vcmask 57344  }
  0x3c   : > { %v225_v2 = vadd.f32 %v224_v1, %v223_v0  ;;  %626 = vset.pattern.permute.xlu0 %v773_v3  ;;  %v774_v8 = vmov 1966171168   ;;  %v775_v39 = vmov 0.0   ;;  %v342_v43 = vld [vmem:[#allocation6] sm:$0xff]  ;;  %vm776_vm1 = vmmov 0   ;;  %s538_s24 = sshll.u32 %s761_s15, 4 }
  0x3d   : > { %v230_v5 = vshrl.u32 %v229_v4, 7  ;;  %v314_v6 = vand.u32 127, %v229_v4  ;;  %v266_v9 = vunpack.c.l.s4 %v774_v8  ;;  %221 = vst.msk [vmem:[#allocation2] sm:$0x1] %vm220_vm0, %v775_v39  ;;  %544 = vmatprep.subr.mxu0 %v775_v39  ;;  %546 = vmatprep.mubr.msk.f32.mxu0 %vm776_vm1, %v775_v39  ;;  %vm344_vm2 = vcmask 64512   ;;  %s214_s19 = scalar_lea.vmem [#allocation8], %s907_s8  ;;  %s929_s30 = scalar_lea.hbm %s975_s3, %s538_s24 }
  0x3e   : > { %226 = vadd.xlane.f32.xlu0 %v225_v2  ;;  %545 = vmatpush3.msra.mxu0 %v342_v43  ;;  %v343_v52 = vld [vmem:[%s974_s2] sm:$0x1]  ;;  %s438_s25 = sshll.u32 %s214_s19, 4  ;;  %s426_s21 = scalar_lea.sflag [#allocation5], %s907_s8  ;;  %s439_s25 = int_to_ptr.vmem [resolvable:$true] %s438_s25 }
  0x3f   : > { %v317_v7 = vsub.s32 %v314_v6, %v230_v5  ;;  %v267_v10 = vunpack.c.0.s8 %v266_v9  ;;  %v231_v11 = vsub.s32 0, %v230_v5  ;;  %v235_v12 = vsub.s32 1, %v230_v5  ;;  %s685_s4 = scalar_lea.vmem %s439_s25, 16  ;;  %s777_s29 = smov [#allocation8]  }
  0x40   : > { %v239_v13 = vsub.s32 2, %v230_v5  ;;  %v243_v14 = vsub.s32 3, %v230_v5  ;;  %v247_v15 = vsub.s32 4, %v230_v5  ;;  %v251_v16 = vsub.s32 5, %v230_v5  ;;  %p686_p1 = scmp.ne.s32.totalorder %s439_s25, %s685_s4  ;;  %s689_s5 = sshll.u32 %s777_s29, 4  ;;  %s690_s5 = int_to_ptr.vmem [resolvable:$false] %s689_s5 }
  0x41   : > { %v255_v17 = vsub.s32 6, %v230_v5  ;;  %v259_v18 = vsub.s32 7, %v230_v5  ;;  %v270_v20 = vsub.s32 %v267_v10, %v230_v5  ;;  %s691_s15 = scalar_lea.vmem %s690_s5, 32  ;;  %p692_p11 = scmp.lt.s32.totalorder %s439_s25, %s690_s5 }
  0x42   : > { %p687_p8 = pnand %p686_p1, %p884_p0  ;;  %p693_p2 = scmp.lt.s32.totalorder %s691_s15, %s685_s4 }
  0x44   : > { %v222_v47 = vld [vmem:[#allocation2] sm:$0x1]  ;;  %p688_p13 = pneg %p687_p8  ;;  %p694_p12 = por %p693_p2, %p692_p11 }
  0x46   : > { %p695_p3 = pnand %p694_p12, %p688_p13 }
  0xc7   : > { %v227_v19 = vpop.xlane.xlu0 %226 }
  0xc8   : > { %v232_v21 = vrot.slane %v227_v19, %v231_v11  ;;  %v236_v22 = vrot.slane %v227_v19, %v235_v12  ;;  %v240_v23 = vrot.slane %v227_v19, %v239_v13  ;;  %v244_v24 = vrot.slane %v227_v19, %v243_v14 }
  0xc9   : > { %v248_v25 = vrot.slane %v227_v19, %v247_v15  ;;  %v252_v26 = vrot.slane %v227_v19, %v251_v16  ;;  %v256_v27 = vrot.slane %v227_v19, %v255_v17  ;;  %v260_v28 = vrot.slane %v227_v19, %v259_v18 }
  0xca   : > { %v261_v29 = vcombine.low %v232_v21, %v236_v22  ;;  %v262_v30 = vcombine.low %v240_v23, %v244_v24 }
  0xcb   : > { %v263_v31 = vcombine.low %v248_v25, %v252_v26  ;;  %v264_v32 = vcombine.low %v256_v27, %v260_v28 }
  0xcc   : > { %v271_v33 = vrot.slane %v261_v29, %v270_v20  ;;  %v278_v34 = vrot.slane %v262_v30, %v270_v20 }
  0xcd   : > { %v285_v35 = vrot.slane %v263_v31, %v270_v20  ;;  %v292_v36 = vrot.slane %v264_v32, %v270_v20 }
  0xce   : > { %v293_v37 = vcombine.low %v271_v33, %v278_v34 }
  0xcf   : > { %v294_v38 = vcombine.low %v285_v35, %v292_v36 }
  0xd0   : > { %v301_v40 = vrot.slane %v293_v37, %v270_v20 }
  0xd1   : > { %v308_v41 = vrot.slane %v294_v38, %v270_v20 }
  0xd3   : > { %v309_v42 = vcombine.low %v301_v40, %v308_v41 }
  0xd5   : > { %311 = vperm.xlu0 %626, %v309_v42  }
 0x150   : > { %v312_v44 = vpop.permute.xlu0 %311 }
 0x151   : > { %v318_v45 = vrot.slane %v312_v44, %v317_v7 }
 0x153   : > { %v325_v46 = vrot.slane %v318_v45, %v270_v20 }
 0x155   : > { %v332_v48 = vrot.slane %v325_v46, %v270_v20 }
 0x157   : > { %v334_v49 = vadd.f32 %v332_v48, %v222_v47 }
 0x159   : > { %336 = vst.msk [vmem:[#allocation2] sm:$0x1] %vm220_vm0, %v334_v49 }
 0x160   : > { %v340_v50 = vld [vmem:[#allocation2] sm:$0x1] }
 0x161   : > { %v341_v51 = vmul.f32 0.00390625, %v340_v50 }
 0x163   : > { %547 = vmatmul.mubr.msk.f32.vlgmr.msra.gmra.mxu0 %vm344_vm2, %v341_v51 }
 0x223   : > { %v414_v53 = vpop.f32.mrf.mxu0 }
 0x224   : > { %v415_v54 = vadd.f32 %v414_v53, %v343_v52 }
 0x225   : > { %v548_v55 = vpop.f32.mrf.mxu0 }
 0x226   : > { %v537_v56 = vmul.f32 -1.442695, %v415_v54 }
 0x228   : > { %627 = vpow2.f32 %v537_v56 }
 0x235   : > { %v628_v57 = vpop.eup %627 }
 0x236   : > { %v421_v58 = vadd.f32 1.0, %v628_v57 }
 0x238   : > { %629 = vrcp.f32 %v421_v58 }
 0x245   : > { %v630_v59 = vpop.eup %629 }
 0x246   : > { %424 = vst.msk [vmem:[%s214_s19] sm:$0x1] %vm220_vm0, %v630_v59 }
 0x247   : > { %698 = shalt.err (!%p695_p3)
}
 0x248   : > { %s699_s6 = scalar_lea.hbm %s929_s30, 16  ;;  %s703_s11 = scalar_lea.hbm %s975_s3, 32 }
 0x249   : > { %p700_p5 = scmp.ne.s32.totalorder %s929_s30, %s699_s6  ;;  %p704_p4 = scmp.lt.s32.totalorder %s929_s30, %s975_s3 }
 0x24a   : > { %p705_p10 = scmp.lt.s32.totalorder %s703_s11, %s699_s6 }
 0x24b   : > { %p701_p7 = pnand %p700_p5, %p884_p0 }
 0x24c   : > { %p706_p9 = por %p705_p10, %p704_p4 }
 0x24d   : > { %p702_p6 = pneg %p701_p7 }
 0x24f   : > { %p707_p1 = pnand %p706_p9, %p702_p6 }
 0x251   : > { %710 = shalt.err (!%p707_p1)
}
 0x252   : > { %555 = dma.vmem_to_hbm [thread:$0]  (%p884_p0), %s439_s25, 16, %s929_s30, %s426_s21  }
 0x253 PF: > { %s450_s22 = sand.u32 1, %s749_s12   ;;  %p986_p8 = scmp.ne.s32.totalorder %s980_s23, 0 }
 0x254   : > { %p987_p13 = scmp.ge.s32.totalorder %s769_s17, 2  ;;  %s451_s24 = scalar_lea.sflag [#allocation5], %s450_s22 }
 0x256   : > { %p566_p11 = pnand %p987_p13, %p986_p8 }
 0x258   : > { %p567_p2 = pneg %p566_p11 }
 0x25a   : > { %744 = dma.done.wait (%p567_p2), %s451_s24, 16  }
 0x25b   : > { %746 = vsyncadd (%p567_p2), %s451_s24, 4294967280  ;;  %s20_s17 = sadd.s32 1, %s769_s17   ;;  %s988_s12 = smov %s753_s13 }
 0x25c   : > { %p17_p12 = scmp.ge.s32.totalorder %s20_s17, 4   ;;  %s989_s13 = smov %s757_s14 }
 0x25d   : > { %s990_s14 = smov %s890_s9  ;;  %s991_s15 = smov %s765_s16 }
 0x25e   : > { %s992_s16 = smov %s994_s28  ;;  %19 = sbr.rel (!%p17_p12) target bundleno = 7 (0x7), region = 89 }
 0x263   :  { %455 = vsyncpa [#allocation4], 1 }
 0x264   :  { %457 = vsyncpa [#allocation4 + $0x1], 1 }
 0x265   :  { %458 = vsyncpa [#allocation7], 1 }
 0x266   :  { %459 = vsyncpa [#allocation5], 1 }
 0x267   :  { %461 = vsyncpa [#allocation5 + $0x1], 1 }

</bundles_post_ra>
